<compile_context>
chip_gen: v7x
topology: tpu7x:2x2x1
jax: 0.10.0
libtpu: 0.0.40
codegen_flags: <defaults>
</compile_context>

<pallas_src>
import jax
import jax.numpy as jnp
from jax.experimental import pallas as pl
from jax.experimental.pallas import tpu as pltpu

_UNROLL_MAX_ROWS = 64  # fully unroll issue/drain loops up to this many rows


def _index_put_kernel(idx_ref, in_hbm, val_hbm, out_hbm, copy_sem):
    # Non-accumulating index_put: overwrite row index[i] of the (aliased)
    # output with row i of `value`, as a direct HBM->HBM DMA per row.
    del in_hbm  # output buffer is aliased to input; untouched rows keep data
    k = val_hbm.shape[0]  # static trace-time constant

    def row_copy(i):
        return pltpu.make_async_copy(
            val_hbm.at[i],              # src: value row i         (HBM)
            out_hbm.at[idx_ref[i]],     # dst: output row index[i] (HBM)
            copy_sem.at[0],             # single shared DMA semaphore
        )

    if k <= _UNROLL_MAX_ROWS:
        # Small K: trace-time unroll, all K DMAs in flight, single tail drain.
        for i in range(k):
            row_copy(i).start()
        for i in range(k):
            row_copy(i).wait()
    else:
        # Large K: rolled loops keep code size constant (same DMA issue cost).
        @pl.loop(0, k)
        def _issue(i):
            row_copy(i).start()

        @pl.loop(0, k)
        def _drain(i):
            row_copy(i).wait()


def index_put_2d_nonaccumulate(inp, index, value):
    n, d = inp.shape
    k = index.shape[0]
    assert value.shape == (k, d)

    if k == 0:
        return inp

    # PyTorch index_put accepts negative indices (wrap to n + idx); normalize
    # on the host so the kernel only ever issues in-bounds HBM DMAs.
    index = jnp.where(index < 0, index + n, index).astype(jnp.int32)

    grid_spec = pltpu.PrefetchScalarGridSpec(
        num_scalar_prefetch=1,          # `index` lands in SMEM
        grid=(1,),                      # single step; all copies issued here
        # TODO(synk): for very large K on v7x, split the issue loop across a
        # grid=(2,) "parallel" axis (one TensorCore each) gated on
        # pltpu.get_tpu_info(); not done here to keep v5e/v6e overhead-free.
        in_specs=[
            # Original tensor: only provides the initial contents of the
            # aliased output buffer; never touched inside the kernel body.
            pl.BlockSpec(memory_space=pl.ANY),
            # Value rows: stay in HBM, DMA'd directly into the output.
            pl.BlockSpec(memory_space=pl.ANY),
        ],
        out_specs=pl.BlockSpec(memory_space=pl.ANY),
        scratch_shapes=[pltpu.SemaphoreType.DMA((1,))],
    )

    bytes_accessed = 2 * k * d * jnp.dtype(inp.dtype).itemsize

    return pl.pallas_call(
        _index_put_kernel,
        out_shape=jax.ShapeDtypeStruct((n, d), inp.dtype),
        grid_spec=grid_spec,
        # Call args are (index, inp, value): alias `inp` (flattened arg 1)
        # with output 0 so rows that are never indexed keep their contents.
        input_output_aliases={1: 0},
        cost_estimate=pl.CostEstimate(
            flops=0, transcendentals=0, bytes_accessed=bytes_accessed),
        compiler_params=pltpu.CompilerParams(
            dimension_semantics=("arbitrary",),
        ),
    )(index, inp, value)


def _run_case(key, n, d, k):
    k_in, k_val, k_perm = jax.random.split(key, 3)
    inp = jax.random.normal(k_in, (n, d), dtype=jnp.float32)
    value = jax.random.normal(k_val, (k, d), dtype=jnp.float32)
    # Unique destination rows (duplicate-index behaviour of non-accumulating
    # index_put is unspecified in PyTorch as well).
    index = jax.random.permutation(k_perm, n)[:k].astype(jnp.int32)

    # Compute the reference BEFORE the kernel call: `inp` is donated below.
    expected = jax.block_until_ready(inp.at[index].set(value))

    # Donate `inp` so input_output_aliases is a true alias (no defensive copy).
    jitted = jax.jit(index_put_2d_nonaccumulate, donate_argnums=(0,))
    out = jax.block_until_ready(jitted(inp, index, value))

    assert out.shape == expected.shape and out.dtype == expected.dtype
    assert bool(jnp.array_equal(out, expected)), "mismatch vs reference index_put"


if __name__ == "__main__":
    key = jax.random.PRNGKey(0)
    k_small, k_large = jax.random.split(key, 2)

    # Small case (unrolled issue path): input (16, 256), index (5,), value (5, 256).
    _run_case(k_small, n=16, d=256, k=5)

    # Larger case (rolled pl.loop issue path): input (128, 256), 96 rows scattered.
    _run_case(k_large, n=128, d=256, k=96)

    print("KERNEL_OK")
</pallas_src>

<mosaic_0001>
module attributes {stable_mosaic.version = 11 : i64} {
  func.func @_index_put_kernel(%arg0: i32, %arg1: memref<5xi32, #tpu.memory_space<smem>>, %arg2: memref<16x256xf32, #tpu.memory_space<any>>, %arg3: memref<5x256xf32, #tpu.memory_space<any>>, %arg4: memref<16x256xf32, #tpu.memory_space<any>>, %arg5: memref<1x!tpu.dma_semaphore, #tpu.memory_space<semaphore_mem>>) attributes {dimension_semantics = [#tpu.dimension_semantics<arbitrary>], iteration_bounds = array<i64: 1>, scalar_prefetch = 1 : i64, scratch_operands = 1 : i64, tpu.core_type = #tpu.core_type<tc>, window_params = [{}, {}, {}]} {
    %c0 = arith.constant 0 : index
    %0 = memref.load %arg1[%c0] : memref<5xi32, #tpu.memory_space<smem>>
    %c0_i32 = arith.constant 0 : i32
    %c0_i32_0 = arith.constant 0 : i32
    %c0_i32_1 = arith.constant 0 : i32
    %1 = tpu.memref_slice %arg3[%c0_i32, %c0_i32_1] : memref<5x256xf32, #tpu.memory_space<any>> -> memref<1x256xf32, #tpu.memory_space<any>>
    %2 = tpu.memref_squeeze %1 : memref<1x256xf32, #tpu.memory_space<any>> -> memref<256xf32, #tpu.memory_space<any>>
    %c0_i32_2 = arith.constant 0 : i32
    %3 = tpu.memref_slice %arg4[%0, %c0_i32_2] : memref<16x256xf32, #tpu.memory_space<any>> -> memref<1x256xf32, #tpu.memory_space<any>>
    %4 = tpu.memref_squeeze %3 : memref<1x256xf32, #tpu.memory_space<any>> -> memref<256xf32, #tpu.memory_space<any>>
    %5 = tpu.memref_slice %arg5[%c0_i32_0] : memref<1x!tpu.dma_semaphore, #tpu.memory_space<semaphore_mem>> -> memref<1x!tpu.dma_semaphore, #tpu.memory_space<semaphore_mem>>
    %6 = tpu.memref_squeeze %5 : memref<1x!tpu.dma_semaphore, #tpu.memory_space<semaphore_mem>> -> memref<!tpu.dma_semaphore, #tpu.memory_space<semaphore_mem>>
    tpu.enqueue_dma source(%2 : memref<256xf32, #tpu.memory_space<any>>) target(%4 : memref<256xf32, #tpu.memory_space<any>>) target_semaphore(%6 : memref<!tpu.dma_semaphore, #tpu.memory_space<semaphore_mem>>)
    %c1 = arith.constant 1 : index
    %7 = memref.load %arg1[%c1] : memref<5xi32, #tpu.memory_space<smem>>
    %c1_i32 = arith.constant 1 : i32
    %c0_i32_3 = arith.constant 0 : i32
    %c0_i32_4 = arith.constant 0 : i32
    %8 = tpu.memref_slice %arg3[%c1_i32, %c0_i32_4] : memref<5x256xf32, #tpu.memory_space<any>> -> memref<1x256xf32, #tpu.memory_space<any>>
    %9 = tpu.memref_squeeze %8 : memref<1x256xf32, #tpu.memory_space<any>> -> memref<256xf32, #tpu.memory_space<any>>
    %c0_i32_5 = arith.constant 0 : i32
    %10 = tpu.memref_slice %arg4[%7, %c0_i32_5] : memref<16x256xf32, #tpu.memory_space<any>> -> memref<1x256xf32, #tpu.memory_space<any>>
    %11 = tpu.memref_squeeze %10 : memref<1x256xf32, #tpu.memory_space<any>> -> memref<256xf32, #tpu.memory_space<any>>
    %12 = tpu.memref_slice %arg5[%c0_i32_3] : memref<1x!tpu.dma_semaphore, #tpu.memory_space<semaphore_mem>> -> memref<1x!tpu.dma_semaphore, #tpu.memory_space<semaphore_mem>>
    %13 = tpu.memref_squeeze %12 : memref<1x!tpu.dma_semaphore, #tpu.memory_space<semaphore_mem>> -> memref<!tpu.dma_semaphore, #tpu.memory_space<semaphore_mem>>
    tpu.enqueue_dma source(%9 : memref<256xf32, #tpu.memory_space<any>>) target(%11 : memref<256xf32, #tpu.memory_space<any>>) target_semaphore(%13 : memref<!tpu.dma_semaphore, #tpu.memory_space<semaphore_mem>>)
    %c2 = arith.constant 2 : index
    %14 = memref.load %arg1[%c2] : memref<5xi32, #tpu.memory_space<smem>>
    %c2_i32 = arith.constant 2 : i32
    %c0_i32_6 = arith.constant 0 : i32
    %c0_i32_7 = arith.constant 0 : i32
    %15 = tpu.memref_slice %arg3[%c2_i32, %c0_i32_7] : memref<5x256xf32, #tpu.memory_space<any>> -> memref<1x256xf32, #tpu.memory_space<any>>
    %16 = tpu.memref_squeeze %15 : memref<1x256xf32, #tpu.memory_space<any>> -> memref<256xf32, #tpu.memory_space<any>>
    %c0_i32_8 = arith.constant 0 : i32
    %17 = tpu.memref_slice %arg4[%14, %c0_i32_8] : memref<16x256xf32, #tpu.memory_space<any>> -> memref<1x256xf32, #tpu.memory_space<any>>
    %18 = tpu.memref_squeeze %17 : memref<1x256xf32, #tpu.memory_space<any>> -> memref<256xf32, #tpu.memory_space<any>>
    %19 = tpu.memref_slice %arg5[%c0_i32_6] : memref<1x!tpu.dma_semaphore, #tpu.memory_space<semaphore_mem>> -> memref<1x!tpu.dma_semaphore, #tpu.memory_space<semaphore_mem>>
    %20 = tpu.memref_squeeze %19 : memref<1x!tpu.dma_semaphore, #tpu.memory_space<semaphore_mem>> -> memref<!tpu.dma_semaphore, #tpu.memory_space<semaphore_mem>>
    tpu.enqueue_dma source(%16 : memref<256xf32, #tpu.memory_space<any>>) target(%18 : memref<256xf32, #tpu.memory_space<any>>) target_semaphore(%20 : memref<!tpu.dma_semaphore, #tpu.memory_space<semaphore_mem>>)
    %c3 = arith.constant 3 : index
    %21 = memref.load %arg1[%c3] : memref<5xi32, #tpu.memory_space<smem>>
    %c3_i32 = arith.constant 3 : i32
    %c0_i32_9 = arith.constant 0 : i32
    %c0_i32_10 = arith.constant 0 : i32
    %22 = tpu.memref_slice %arg3[%c3_i32, %c0_i32_10] : memref<5x256xf32, #tpu.memory_space<any>> -> memref<1x256xf32, #tpu.memory_space<any>>
    %23 = tpu.memref_squeeze %22 : memref<1x256xf32, #tpu.memory_space<any>> -> memref<256xf32, #tpu.memory_space<any>>
    %c0_i32_11 = arith.constant 0 : i32
    %24 = tpu.memref_slice %arg4[%21, %c0_i32_11] : memref<16x256xf32, #tpu.memory_space<any>> -> memref<1x256xf32, #tpu.memory_space<any>>
    %25 = tpu.memref_squeeze %24 : memref<1x256xf32, #tpu.memory_space<any>> -> memref<256xf32, #tpu.memory_space<any>>
    %26 = tpu.memref_slice %arg5[%c0_i32_9] : memref<1x!tpu.dma_semaphore, #tpu.memory_space<semaphore_mem>> -> memref<1x!tpu.dma_semaphore, #tpu.memory_space<semaphore_mem>>
    %27 = tpu.memref_squeeze %26 : memref<1x!tpu.dma_semaphore, #tpu.memory_space<semaphore_mem>> -> memref<!tpu.dma_semaphore, #tpu.memory_space<semaphore_mem>>
    tpu.enqueue_dma source(%23 : memref<256xf32, #tpu.memory_space<any>>) target(%25 : memref<256xf32, #tpu.memory_space<any>>) target_semaphore(%27 : memref<!tpu.dma_semaphore, #tpu.memory_space<semaphore_mem>>)
    %c4 = arith.constant 4 : index
    %28 = memref.load %arg1[%c4] : memref<5xi32, #tpu.memory_space<smem>>
    %c4_i32 = arith.constant 4 : i32
    %c0_i32_12 = arith.constant 0 : i32
    %c0_i32_13 = arith.constant 0 : i32
    %29 = tpu.memref_slice %arg3[%c4_i32, %c0_i32_13] : memref<5x256xf32, #tpu.memory_space<any>> -> memref<1x256xf32, #tpu.memory_space<any>>
    %30 = tpu.memref_squeeze %29 : memref<1x256xf32, #tpu.memory_space<any>> -> memref<256xf32, #tpu.memory_space<any>>
    %c0_i32_14 = arith.constant 0 : i32
    %31 = tpu.memref_slice %arg4[%28, %c0_i32_14] : memref<16x256xf32, #tpu.memory_space<any>> -> memref<1x256xf32, #tpu.memory_space<any>>
    %32 = tpu.memref_squeeze %31 : memref<1x256xf32, #tpu.memory_space<any>> -> memref<256xf32, #tpu.memory_space<any>>
    %33 = tpu.memref_slice %arg5[%c0_i32_12] : memref<1x!tpu.dma_semaphore, #tpu.memory_space<semaphore_mem>> -> memref<1x!tpu.dma_semaphore, #tpu.memory_space<semaphore_mem>>
    %34 = tpu.memref_squeeze %33 : memref<1x!tpu.dma_semaphore, #tpu.memory_space<semaphore_mem>> -> memref<!tpu.dma_semaphore, #tpu.memory_space<semaphore_mem>>
    tpu.enqueue_dma source(%30 : memref<256xf32, #tpu.memory_space<any>>) target(%32 : memref<256xf32, #tpu.memory_space<any>>) target_semaphore(%34 : memref<!tpu.dma_semaphore, #tpu.memory_space<semaphore_mem>>)
    %c0_15 = arith.constant 0 : index
    %35 = memref.load %arg1[%c0_15] : memref<5xi32, #tpu.memory_space<smem>>
    %c0_i32_16 = arith.constant 0 : i32
    %c0_i32_17 = arith.constant 0 : i32
    %c0_i32_18 = arith.constant 0 : i32
    %36 = tpu.memref_slice %arg3[%c0_i32_16, %c0_i32_18] : memref<5x256xf32, #tpu.memory_space<any>> -> memref<1x256xf32, #tpu.memory_space<any>>
    %37 = tpu.memref_squeeze %36 : memref<1x256xf32, #tpu.memory_space<any>> -> memref<256xf32, #tpu.memory_space<any>>
    %c0_i32_19 = arith.constant 0 : i32
    %38 = tpu.memref_slice %arg4[%35, %c0_i32_19] : memref<16x256xf32, #tpu.memory_space<any>> -> memref<1x256xf32, #tpu.memory_space<any>>
    %39 = tpu.memref_squeeze %38 : memref<1x256xf32, #tpu.memory_space<any>> -> memref<256xf32, #tpu.memory_space<any>>
    %40 = tpu.memref_slice %arg5[%c0_i32_17] : memref<1x!tpu.dma_semaphore, #tpu.memory_space<semaphore_mem>> -> memref<1x!tpu.dma_semaphore, #tpu.memory_space<semaphore_mem>>
    %41 = tpu.memref_squeeze %40 : memref<1x!tpu.dma_semaphore, #tpu.memory_space<semaphore_mem>> -> memref<!tpu.dma_semaphore, #tpu.memory_space<semaphore_mem>>
    tpu.wait_dma2 semaphore(%41 : memref<!tpu.dma_semaphore, #tpu.memory_space<semaphore_mem>>) src(%37 : memref<256xf32, #tpu.memory_space<any>>) dst(%39 : memref<256xf32, #tpu.memory_space<any>>)
    %c1_20 = arith.constant 1 : index
    %42 = memref.load %arg1[%c1_20] : memref<5xi32, #tpu.memory_space<smem>>
    %c1_i32_21 = arith.constant 1 : i32
    %c0_i32_22 = arith.constant 0 : i32
    %c0_i32_23 = arith.constant 0 : i32
    %43 = tpu.memref_slice %arg3[%c1_i32_21, %c0_i32_23] : memref<5x256xf32, #tpu.memory_space<any>> -> memref<1x256xf32, #tpu.memory_space<any>>
    %44 = tpu.memref_squeeze %43 : memref<1x256xf32, #tpu.memory_space<any>> -> memref<256xf32, #tpu.memory_space<any>>
    %c0_i32_24 = arith.constant 0 : i32
    %45 = tpu.memref_slice %arg4[%42, %c0_i32_24] : memref<16x256xf32, #tpu.memory_space<any>> -> memref<1x256xf32, #tpu.memory_space<any>>
    %46 = tpu.memref_squeeze %45 : memref<1x256xf32, #tpu.memory_space<any>> -> memref<256xf32, #tpu.memory_space<any>>
    %47 = tpu.memref_slice %arg5[%c0_i32_22] : memref<1x!tpu.dma_semaphore, #tpu.memory_space<semaphore_mem>> -> memref<1x!tpu.dma_semaphore, #tpu.memory_space<semaphore_mem>>
    %48 = tpu.memref_squeeze %47 : memref<1x!tpu.dma_semaphore, #tpu.memory_space<semaphore_mem>> -> memref<!tpu.dma_semaphore, #tpu.memory_space<semaphore_mem>>
    tpu.wait_dma2 semaphore(%48 : memref<!tpu.dma_semaphore, #tpu.memory_space<semaphore_mem>>) src(%44 : memref<256xf32, #tpu.memory_space<any>>) dst(%46 : memref<256xf32, #tpu.memory_space<any>>)
    %c2_25 = arith.constant 2 : index
    %49 = memref.load %arg1[%c2_25] : memref<5xi32, #tpu.memory_space<smem>>
    %c2_i32_26 = arith.constant 2 : i32
    %c0_i32_27 = arith.constant 0 : i32
    %c0_i32_28 = arith.constant 0 : i32
    %50 = tpu.memref_slice %arg3[%c2_i32_26, %c0_i32_28] : memref<5x256xf32, #tpu.memory_space<any>> -> memref<1x256xf32, #tpu.memory_space<any>>
    %51 = tpu.memref_squeeze %50 : memref<1x256xf32, #tpu.memory_space<any>> -> memref<256xf32, #tpu.memory_space<any>>
    %c0_i32_29 = arith.constant 0 : i32
    %52 = tpu.memref_slice %arg4[%49, %c0_i32_29] : memref<16x256xf32, #tpu.memory_space<any>> -> memref<1x256xf32, #tpu.memory_space<any>>
    %53 = tpu.memref_squeeze %52 : memref<1x256xf32, #tpu.memory_space<any>> -> memref<256xf32, #tpu.memory_space<any>>
    %54 = tpu.memref_slice %arg5[%c0_i32_27] : memref<1x!tpu.dma_semaphore, #tpu.memory_space<semaphore_mem>> -> memref<1x!tpu.dma_semaphore, #tpu.memory_space<semaphore_mem>>
    %55 = tpu.memref_squeeze %54 : memref<1x!tpu.dma_semaphore, #tpu.memory_space<semaphore_mem>> -> memref<!tpu.dma_semaphore, #tpu.memory_space<semaphore_mem>>
    tpu.wait_dma2 semaphore(%55 : memref<!tpu.dma_semaphore, #tpu.memory_space<semaphore_mem>>) src(%51 : memref<256xf32, #tpu.memory_space<any>>) dst(%53 : memref<256xf32, #tpu.memory_space<any>>)
    %c3_30 = arith.constant 3 : index
    %56 = memref.load %arg1[%c3_30] : memref<5xi32, #tpu.memory_space<smem>>
    %c3_i32_31 = arith.constant 3 : i32
    %c0_i32_32 = arith.constant 0 : i32
    %c0_i32_33 = arith.constant 0 : i32
    %57 = tpu.memref_slice %arg3[%c3_i32_31, %c0_i32_33] : memref<5x256xf32, #tpu.memory_space<any>> -> memref<1x256xf32, #tpu.memory_space<any>>
    %58 = tpu.memref_squeeze %57 : memref<1x256xf32, #tpu.memory_space<any>> -> memref<256xf32, #tpu.memory_space<any>>
    %c0_i32_34 = arith.constant 0 : i32
    %59 = tpu.memref_slice %arg4[%56, %c0_i32_34] : memref<16x256xf32, #tpu.memory_space<any>> -> memref<1x256xf32, #tpu.memory_space<any>>
    %60 = tpu.memref_squeeze %59 : memref<1x256xf32, #tpu.memory_space<any>> -> memref<256xf32, #tpu.memory_space<any>>
    %61 = tpu.memref_slice %arg5[%c0_i32_32] : memref<1x!tpu.dma_semaphore, #tpu.memory_space<semaphore_mem>> -> memref<1x!tpu.dma_semaphore, #tpu.memory_space<semaphore_mem>>
    %62 = tpu.memref_squeeze %61 : memref<1x!tpu.dma_semaphore, #tpu.memory_space<semaphore_mem>> -> memref<!tpu.dma_semaphore, #tpu.memory_space<semaphore_mem>>
    tpu.wait_dma2 semaphore(%62 : memref<!tpu.dma_semaphore, #tpu.memory_space<semaphore_mem>>) src(%58 : memref<256xf32, #tpu.memory_space<any>>) dst(%60 : memref<256xf32, #tpu.memory_space<any>>)
    %c4_35 = arith.constant 4 : index
    %63 = memref.load %arg1[%c4_35] : memref<5xi32, #tpu.memory_space<smem>>
    %c4_i32_36 = arith.constant 4 : i32
    %c0_i32_37 = arith.constant 0 : i32
    %c0_i32_38 = arith.constant 0 : i32
    %64 = tpu.memref_slice %arg3[%c4_i32_36, %c0_i32_38] : memref<5x256xf32, #tpu.memory_space<any>> -> memref<1x256xf32, #tpu.memory_space<any>>
    %65 = tpu.memref_squeeze %64 : memref<1x256xf32, #tpu.memory_space<any>> -> memref<256xf32, #tpu.memory_space<any>>
    %c0_i32_39 = arith.constant 0 : i32
    %66 = tpu.memref_slice %arg4[%63, %c0_i32_39] : memref<16x256xf32, #tpu.memory_space<any>> -> memref<1x256xf32, #tpu.memory_space<any>>
    %67 = tpu.memref_squeeze %66 : memref<1x256xf32, #tpu.memory_space<any>> -> memref<256xf32, #tpu.memory_space<any>>
    %68 = tpu.memref_slice %arg5[%c0_i32_37] : memref<1x!tpu.dma_semaphore, #tpu.memory_space<semaphore_mem>> -> memref<1x!tpu.dma_semaphore, #tpu.memory_space<semaphore_mem>>
    %69 = tpu.memref_squeeze %68 : memref<1x!tpu.dma_semaphore, #tpu.memory_space<semaphore_mem>> -> memref<!tpu.dma_semaphore, #tpu.memory_space<semaphore_mem>>
    tpu.wait_dma2 semaphore(%69 : memref<!tpu.dma_semaphore, #tpu.memory_space<semaphore_mem>>) src(%65 : memref<256xf32, #tpu.memory_space<any>>) dst(%67 : memref<256xf32, #tpu.memory_space<any>>)
    return
  }
}

</mosaic_0001>

<bundles_post_ra>
// kernel: index_put_2d_nonaccumulate.1
= control target key start
LH: loop header
LB: loop body
LE: loop exit
PB: predicated region body
PF: predicated region fallthrough
CT: control target
= control target key end

     0   :  { %s318_s0 = inlined_call_operand.vmem [shape: s32[5], index: 0, kind: input, shape index: {}]   ;;  %s319_s1 = inlined_call_operand.hbm [shape: f32[16,256], index: 1, kind: input, shape index: {}, may-alias: {1,3}]   ;;  %s320_s2 = inlined_call_operand.hbm [shape: f32[5,256], index: 2, kind: input, shape index: {}]   ;;  %s321_s3 = inlined_call_operand.hbm [shape: f32[16,256], index: 3, kind: output, shape index: {}, may-alias: {1,3}]  }
   0x1   :  { %s8_s14 = sshll.u32 %s318_s0, 4  ;;  %s9_s14 = int_to_ptr.vmem [resolvable:$true] %s8_s14 }
   0x2   :  { %s214_s15 = scalar_lea.vmem %s9_s14, 16  ;;  %p219_p1 = scmp.lt.s32.totalorder %s9_s14, %s9_s14 }
   0x3   :  { %p215_p0 = scmp.ne.s32.totalorder %s9_s14, %s214_s15  ;;  %p220_p2 = scmp.lt.s32.totalorder %s214_s15, %s214_s15 }
   0x5   :  { %p221_p3 = por %p220_p2, %p219_p1 }
   0x7   :  { %p222_p4 = pnand %p221_p3, %p215_p0 }
   0x9   :  { %225 = shalt.err (!%p222_p4)  }
   0xa   :  { %s230_s16 = smov [#allocation4]  }
   0xb   :  { %11 = dma.vmem_to_smem %s9_s14, 16, %s230_s16, [#allocation3] }
   0xc   :  { %226 = dma.done.wait [#allocation3], 16 }
   0xd   :  { %227 = vsyncadd [#allocation3], 4294967280 }
   0xe   :  { %13 = sfence }
   0xf   :  { %s14_s1 = sld [smem:[#allocation4]]  ;;  %s231_s17 = smov 128  }
  0x10   :  { %33 = sst [smem:[#allocation6]] %s231_s17  ;;  %s232_s0 = smov 1  }
  0x11   :  { %35 = sst [smem:[#allocation6 + $0x1]] %s231_s17  ;;  %s233_s26 = smov [#allocation2]  }
  0x12   :  { %37 = sst [smem:[#allocation6 + $0x2]] %s232_s0  ;;  %s234_s27 = smov [#allocation5]  }
  0x13   :  { %s235_s28 = smov 0   ;;  %s41_s10 = scalar_lea.hbm %s320_s2, 16 }
  0x14   :  { %s236_s16 = smov [#allocation7]   ;;  %s68_s23 = scalar_lea.hbm %s320_s2, 32 }
  0x15   :  { %s15_s18 = sshrl.u32 %s14_s1, 3  ;;  %s16_s19 = sand.u32 7, %s14_s1  }
  0x16   :  { %s189_s20 = sshll.u32 %s15_s18, 4 }
  0x17   :  { %s18_s21 = sadd.s32 %s189_s20, %s16_s19 }
  0x18   :  { %s190_s22 = sshll.u32 %s18_s21, 4 }
  0x19   :  { %s20_s25 = scalar_lea.hbm %s321_s3, %s190_s22 }
  0x1a   :  { %39 = dma.general %s320_s2, 32, %s20_s25, %s233_s26, %s234_s27, [#allocation6], %s235_s28, 0  }
  0x1b   :  { %s191_s4 = sld [smem:[#allocation4 + $0x1]]  ;;  %60 = sst [smem:[#allocation8]] %s231_s17 }
  0x1c   :  { %62 = sst [smem:[#allocation8 + $0x1]] %s231_s17 }
  0x1d   :  { %64 = sst [smem:[#allocation8 + $0x2]] %s232_s0 }
  0x21   :  { %s42_s5 = sshrl.u32 %s191_s4, 3  ;;  %s43_s6 = sand.u32 7, %s191_s4  }
  0x22   :  { %s192_s7 = sshll.u32 %s42_s5, 4  ;;  %s237_s4 = smov [#allocation9]  }
  0x23   :  { %s45_s11 = sadd.s32 %s192_s7, %s43_s6 }
  0x24   :  { %s193_s12 = sshll.u32 %s45_s11, 4  ;;  %s95_s11 = scalar_lea.hbm %s320_s2, 48 }
  0x25   :  { %s47_s15 = scalar_lea.hbm %s321_s3, %s193_s12 }
  0x26   :  { %66 = dma.general %s41_s10, 32, %s47_s15, %s233_s26, %s236_s16, [#allocation8], %s235_s28, 0  }
  0x27   :  { %s194_s1 = sld [smem:[#allocation4 + $0x2]]  ;;  %87 = sst [smem:[#allocation10]] %s231_s17 }
  0x28   :  { %89 = sst [smem:[#allocation10 + $0x1]] %s231_s17 }
  0x29   :  { %91 = sst [smem:[#allocation10 + $0x2]] %s232_s0 }
  0x2d   :  { %s69_s18 = sshrl.u32 %s194_s1, 3  ;;  %s70_s19 = sand.u32 7, %s194_s1  }
  0x2e   :  { %s195_s20 = sshll.u32 %s69_s18, 4  ;;  %s238_s1 = smov [#allocation11]  }
  0x2f   :  { %s72_s24 = sadd.s32 %s195_s20, %s70_s19 }
  0x30   :  { %s196_s25 = sshll.u32 %s72_s24, 4  ;;  %s122_s24 = scalar_lea.hbm %s320_s2, 64 }
  0x31   :  { %s74_s30 = scalar_lea.hbm %s321_s3, %s196_s25 }
  0x32   :  { %93 = dma.general %s68_s23, 32, %s74_s30, %s233_s26, %s237_s4, [#allocation10], %s235_s28, 0  }
  0x33   :  { %s197_s5 = sld [smem:[#allocation4 + $0x3]]  ;;  %114 = sst [smem:[#allocation12]] %s231_s17 }
  0x34   :  { %116 = sst [smem:[#allocation12 + $0x1]] %s231_s17 }
  0x35   :  { %118 = sst [smem:[#allocation12 + $0x2]] %s232_s0 }
  0x39   :  { %s96_s6 = sshrl.u32 %s197_s5, 3  ;;  %s97_s7 = sand.u32 7, %s197_s5  }
  0x3a   :  { %s198_s8 = sshll.u32 %s96_s6, 4  ;;  %s239_s5 = smov [#allocation13]  }
  0x3b   :  { %s99_s12 = sadd.s32 %s198_s8, %s97_s7 }
  0x3c   :  { %s199_s13 = sshll.u32 %s99_s12, 4 }
  0x3d   :  { %s101_s16 = scalar_lea.hbm %s321_s3, %s199_s13 }
  0x3e   :  { %120 = dma.general %s95_s11, 32, %s101_s16, %s233_s26, %s238_s1, [#allocation12], %s235_s28, 0  }
  0x3f   :  { %s200_s18 = sld [smem:[#allocation4 + $0x4]]  ;;  %141 = sst [smem:[#allocation14]] %s231_s17 }
  0x40   :  { %143 = sst [smem:[#allocation14 + $0x1]] %s231_s17 }
  0x41   :  { %145 = sst [smem:[#allocation14 + $0x2]] %s232_s0 }
  0x45   :  { %s123_s19 = sshrl.u32 %s200_s18, 3  ;;  %s124_s20 = sand.u32 7, %s200_s18  }
  0x46   :  { %s201_s21 = sshll.u32 %s123_s19, 4 }
  0x47   :  { %s126_s25 = sadd.s32 %s201_s21, %s124_s20 }
  0x48   :  { %s202_s27 = sshll.u32 %s126_s25, 4 }
  0x49   :  { %s128_s4 = scalar_lea.hbm %s321_s3, %s202_s27 }
  0x4a   :  { %147 = dma.general %s122_s24, 32, %s128_s4, %s233_s26, %s239_s5, [#allocation14], %s235_s28, 0  }
  0x4b   :  { %228 = dma.done.wait [#allocation2], 160 }
  0x4c   :  { %229 = vsyncadd [#allocation2], 4294967136 }
  0x4d   :  { %163 = vsyncmov [#allocation2] }
  0x50   :  { %s164_s17 = vpop.sfrf %163 }
  0x51   :  { %p203_p5 = scmp.ne.s32.totalorder %s164_s17, 0 }
  0x53   :  { %168 = shalt.err (%p203_p5)  }

</bundles_post_ra>
